<compile_context>
chip_gen: v5e
topology: v5e:2x2
jax: 0.10.0
libtpu: 0.0.40
codegen_flags: <defaults>
</compile_context>

<pallas_src>
import jax
import jax.numpy as jnp
from jax import lax
from jax.experimental import pallas as pl
from jax.experimental.pallas import tpu as pltpu


def _round_up(x, m):
    return ((x + m - 1) // m) * m


def _vmem_capacity_bytes():
    """Physical VMEM of the current chip; conservative fallback = v7x 64 MiB."""
    try:
        return int(pltpu.get_tpu_info().vmem_capacity_bytes)
    except Exception:
        return 64 * 1024 * 1024


def _pick_t_block(T, b_block, gate_width, itemsize, budget_bytes):
    """Largest divisor of T whose double-buffered gxf block fits the budget."""
    per_step = 2 * b_block * gate_width * itemsize  # x2: double buffering
    max_t = max(1, budget_bytes // per_step)
    t_blk = 1
    for d in range(1, T + 1):
        if T % d == 0 and d <= max_t:
            t_blk = d
    return t_blk


# ---------------------------------------------------------------------------
# Kernel. Grid = (batch blocks ["parallel"], T blocks ["arbitrary"]).
#   gxf_ref : (t_blk, b_blk, 4H)  hoisted input preactivations (g block x2)
#   gxb_ref : (b_blk, 4H)         preactivations of x[:, -1] for the bw cell
#   whh_ref : (H, 4H)             fused forward recurrent weights (g block x2)
#   w1_ref  : (2, H, h1)          linear1 split per direction (fw / bw rows)
#   b1_ref  : (1, h1)   w2_ref : (h1, out)   b2_ref : (1, out)
#   o_ref   : (b_blk, out)
#   h_scr / c_scr : (b_blk, H) f32 VMEM scratch carrying state across T blocks
# ---------------------------------------------------------------------------
def _lstm_head_kernel(gxf_ref, gxb_ref, whh_ref, w1_ref, b1_ref, w2_ref,
                      b2_ref, o_ref, h_scr, c_scr):
    f32 = jnp.float32
    t_blk = gxf_ref.shape[0]
    H = gxf_ref.shape[-1] // 4
    t_idx = pl.program_id(1)

    @pl.when(t_idx == 0)
    def _init():
        h_scr[...] = jnp.zeros_like(h_scr)
        c_scr[...] = jnp.zeros_like(c_scr)

    whh = whh_ref[...]  # (H, 4H) resident across the whole grid

    def cell(h, c, pre_x):
        # Serial dependence chain: ONE fused (b,H) x (H,4H) MXU push per step.
        pre = pre_x.astype(f32) + jnp.dot(h.astype(whh.dtype), whh,
                                          preferred_element_type=f32)
        # ONE fused EUP sigmoid over the whole (b, 4H) slab; the g block was
        # pre-scaled by 2 so tanh(g) = 2*sigmoid(2g) - 1.
        s = jax.nn.sigmoid(pre)
        i_g = s[:, 0 * H:1 * H]
        f_g = s[:, 1 * H:2 * H]
        g_g = 2.0 * s[:, 2 * H:3 * H] - 1.0
        o_g = s[:, 3 * H:4 * H]
        c = f_g * c + i_g * g_g
        h = o_g * jnp.tanh(c)
        return h, c

    h = h_scr[...]
    c = c_scr[...]
    if t_blk <= 16:
        # Small static block: full unroll keeps LLO scheduling visibility.
        for t in range(t_blk):
            h, c = cell(h, c, gxf_ref[t])
    else:
        # Large streamed block: bounded unroll avoids vreg-file spills.
        def body(t, carry):
            hh, cc = carry
            return cell(hh, cc, gxf_ref[t])
        h, c = lax.fori_loop(0, t_blk, body, (h, c), unroll=min(4, t_blk))
    h_scr[...] = h
    c_scr[...] = c

    @pl.when(t_idx == pl.num_programs(1) - 1)
    def _finalize():
        # Backward direction: exactly ONE cell step on x[:, -1] from zero
        # state. whh_b is never needed (it multiplies h0 == 0); the forget
        # gate term multiplies c0 == 0.
        sb = jax.nn.sigmoid(gxb_ref[...].astype(f32))
        i_b = sb[:, 0 * H:1 * H]
        g_b = 2.0 * sb[:, 2 * H:3 * H] - 1.0
        o_b = sb[:, 3 * H:4 * H]
        h_bw = o_b * jnp.tanh(i_b * g_b)
        # Fused MLP head; w1 pre-split per direction -> no lane-axis concat.
        cdt = w1_ref.dtype
        z = (jnp.dot(h.astype(cdt), w1_ref[0], preferred_element_type=f32)
             + jnp.dot(h_bw.astype(cdt), w1_ref[1], preferred_element_type=f32)
             + b1_ref[...])
        o_ref[...] = (jnp.dot(z.astype(cdt), w2_ref[...],
                              preferred_element_type=f32) + b2_ref[...])


# ---------------------------------------------------------------------------
# Forward pass matching the PyTorch module.
# ---------------------------------------------------------------------------
def _lstm_forward_impl(x, params, *, compute_dtype=jnp.float32,
                       t_block=None, b_block=None):
    x = x.astype(jnp.float32)
    B, T, D = x.shape
    H = params["whh_f"].shape[0]
    h1 = params["w1"].shape[-1]
    out_c = params["w2"].shape[1]
    G = 4 * H
    itemsize = jnp.dtype(compute_dtype).itemsize

    # Pre-scale the g (cell-candidate) gate block by 2 so the kernel can use a
    # single fused sigmoid per step with tanh(x) = 2*sigmoid(2x) - 1.
    gate_scale = jnp.repeat(jnp.asarray([1.0, 1.0, 2.0, 1.0], jnp.float32), H)
    wih_f = params["wih_f"] * gate_scale
    whh_f = (params["whh_f"] * gate_scale).astype(compute_dtype)
    b_f = params["b_f"] * gate_scale
    wih_b = params["wih_b"] * gate_scale
    b_b = params["b_b"] * gate_scale

    # Pad batch to full sublanes (8 for f32, 16 for packed bf16).
    sub = 16 if compute_dtype == jnp.bfloat16 else 8
    if b_block is None:
        b_block = min(128, _round_up(B, sub))
    B_pad = _round_up(B, b_block)
    if B_pad != B:
        x = jnp.pad(x, ((0, B_pad - B), (0, 0), (0, 0)))

    # Hoisted input projections (parallel over T, off the serial chain),
    # lane-dense (T, B, 4H) so the kernel consumes one slab per step.
    gxf = (jnp.einsum("btd,dg->tbg", x, wih_f) + b_f).astype(compute_dtype)
    gxb = (x[:, -1] @ wih_b + b_b).astype(compute_dtype)

    vmem_cap = _vmem_capacity_bytes()
    if t_block is None:
        t_block = _pick_t_block(T, b_block, G, itemsize,
                                budget_bytes=vmem_cap // 8)
    assert T % t_block == 0 and B_pad % b_block == 0

    grid = (B_pad // b_block, T // t_block)
    w1 = params["w1"].astype(compute_dtype)
    w2 = params["w2"].astype(compute_dtype)

    cost = pl.CostEstimate(
        flops=2 * T * B_pad * H * G + 2 * B_pad * (2 * H * h1 + h1 * out_c),
        transcendentals=(T + 1) * B_pad * 5 * H,
        bytes_accessed=((T + 1) * B_pad * G * itemsize
                        + (H * G + 2 * H * h1 + h1 * out_c) * itemsize
                        + B_pad * out_c * 4),
    )

    out = pl.pallas_call(
        _lstm_head_kernel,
        out_shape=jax.ShapeDtypeStruct((B_pad, out_c), jnp.float32),
        grid_spec=pltpu.PrefetchScalarGridSpec(
            num_scalar_prefetch=0,
            grid=grid,
            in_specs=[
                pl.BlockSpec((t_block, b_block, G), lambda b, t: (t, b, 0)),
                pl.BlockSpec((b_block, G), lambda b, t: (b, 0)),
                pl.BlockSpec((H, G), lambda b, t: (0, 0)),
                pl.BlockSpec((2, H, h1), lambda b, t: (0, 0, 0)),
                pl.BlockSpec((1, h1), lambda b, t: (0, 0)),
                pl.BlockSpec((h1, out_c), lambda b, t: (0, 0)),
                pl.BlockSpec((1, out_c), lambda b, t: (0, 0)),
            ],
            out_specs=pl.BlockSpec((b_block, out_c), lambda b, t: (b, 0)),
            scratch_shapes=[
                pltpu.VMEM((b_block, H), jnp.float32),
                pltpu.VMEM((b_block, H), jnp.float32),
            ],
        ),
        compiler_params=pltpu.CompilerParams(
            dimension_semantics=("parallel", "arbitrary"),
            vmem_limit_bytes=int(min(vmem_cap * 3 // 4, 100 * 1024 * 1024)),
        ),
        cost_estimate=cost,
    )(gxf, gxb, whh_f, w1, params["b1"], w2, params["b2"])
    return out[:B]


lstm_forward = jax.jit(_lstm_forward_impl,
                       static_argnames=("compute_dtype", "t_block", "b_block"))


# ---------------------------------------------------------------------------
# Pure-JAX reference: full bidirectional scan + head (validates that pruning
# the backward recurrence and the sigmoid/tanh fusion are exact).
# ---------------------------------------------------------------------------
def lstm_forward_ref(x, params):
    x = x.astype(jnp.float32)
    B, T, D = x.shape
    H = params["whh_f"].shape[0]

    def cell(carry, x_t, Wih, Whh, b):
        h, c = carry
        g = x_t @ Wih + h @ Whh + b
        i = jax.nn.sigmoid(g[:, :H])
        f = jax.nn.sigmoid(g[:, H:2 * H])
        gg = jnp.tanh(g[:, 2 * H:3 * H])
        o = jax.nn.sigmoid(g[:, 3 * H:])
        c = f * c + i * gg
        h = o * jnp.tanh(c)
        return (h, c), h

    h0 = jnp.zeros((B, H), jnp.float32)
    c0 = jnp.zeros((B, H), jnp.float32)
    xs = jnp.transpose(x, (1, 0, 2))
    _, out_f = jax.lax.scan(
        lambda ca, xt: cell(ca, xt, params["wih_f"], params["whh_f"], params["b_f"]),
        (h0, c0), xs)
    _, out_b = jax.lax.scan(
        lambda ca, xt: cell(ca, xt, params["wih_b"], params["whh_b"], params["b_b"]),
        (h0, c0), xs[::-1])
    # PyTorch lstm(x)[0][:, -1, :] = [fw hidden after full seq,
    #                                 bw hidden after one step on x[:, -1]]
    last = jnp.concatenate([out_f[-1], out_b[0]], axis=-1)            # (B, 2H)
    w1 = jnp.concatenate([params["w1"][0], params["w1"][1]], axis=0)  # (2H, h1)
    z = last @ w1 + params["b1"]
    return z @ params["w2"] + params["b2"]


# ---------------------------------------------------------------------------
# Deterministic PyTorch-style init in the fused kernel layout:
#   W_ih (D, 4H), W_hh (H, 4H), bias (1, 4H), gate order [i, f, g, o];
#   linear1 split per direction (2, H, h1).
# ---------------------------------------------------------------------------
def init_params(key, in_channels, hidden_channels, hidden_1, out_channels):
    H, D = hidden_channels, in_channels
    k_lstm = 1.0 / jnp.sqrt(1.0 * H)
    k_l1 = 1.0 / jnp.sqrt(2.0 * H)
    k_l2 = 1.0 / jnp.sqrt(1.0 * hidden_1)
    keys = jax.random.split(key, 12)
    u = lambda k, shape, lim: jax.random.uniform(k, shape, jnp.float32, -lim, lim)

    def lstm_dir(ks):
        # PyTorch layout: weight_ih (4H, D), weight_hh (4H, H), bias_ih/hh (4H,)
        w_ih = u(ks[0], (4 * H, D), k_lstm)
        w_hh = u(ks[1], (4 * H, H), k_lstm)
        b = u(ks[2], (4 * H,), k_lstm) + u(ks[3], (4 * H,), k_lstm)
        return w_ih.T, w_hh.T, b.reshape(1, 4 * H)

    wih_f, whh_f, b_f = lstm_dir(keys[0:4])
    wih_b, whh_b, b_b = lstm_dir(keys[4:8])
    w1 = u(keys[8], (hidden_1, 2 * H), k_l1).T.reshape(2, H, hidden_1)
    return {
        "wih_f": wih_f, "whh_f": whh_f, "b_f": b_f,
        "wih_b": wih_b, "whh_b": whh_b, "b_b": b_b,
        "w1": w1,
        "b1": u(keys[9], (hidden_1,), k_l1).reshape(1, -1),
        "w2": u(keys[10], (out_channels, hidden_1), k_l2).T,   # (h1, out)
        "b2": u(keys[11], (out_channels,), k_l2).reshape(1, -1),
    }


if __name__ == "__main__":
    B, T = 2, 8                          # batch, sequence length
    in_channels, hidden_channels = 4, 32
    hidden_1, out_channels = 16, 8

    key = jax.random.PRNGKey(0)
    kx, kp = jax.random.split(key)
    x = jax.random.normal(kx, (B, T, in_channels), jnp.float32)
    params = init_params(kp, in_channels, hidden_channels, hidden_1, out_channels)

    ref = lstm_forward_ref(x, params)

    # f32 path with a forced small T block -> exercises the streamed grid and
    # the h/c scratch carry across T blocks.
    out = jax.block_until_ready(lstm_forward(x, params, t_block=2))
    assert out.shape == (B, out_channels), out.shape
    assert jnp.allclose(out, ref, rtol=1e-4, atol=1e-4), (out, ref)

    # f32 path with auto (VMEM-budget-derived) block sizing.
    out_auto = jax.block_until_ready(lstm_forward(x, params))
    assert jnp.allclose(out_auto, ref, rtol=1e-4, atol=1e-4), (out_auto, ref)

    # bf16 production path (v6e/v7x MXU): bf16 gxf/weights, f32 state/accum.
    out_bf16 = jax.block_until_ready(
        lstm_forward(x, params, compute_dtype=jnp.bfloat16))
    assert jnp.allclose(out_bf16, ref, rtol=5e-2, atol=5e-2), (out_bf16, ref)

    print("KERNEL_OK")
</pallas_src>

<mosaic_0001>
module attributes {stable_mosaic.version = 11 : i64} {
  func.func @_lstm_head_kernel(%arg0: i32, %arg1: i32, %arg2: memref<2x8x128xf32, #tpu.memory_space<vmem>>, %arg3: memref<8x128xf32, #tpu.memory_space<vmem>>, %arg4: memref<32x128xf32, #tpu.memory_space<vmem>>, %arg5: memref<2x32x16xf32, #tpu.memory_space<vmem>>, %arg6: memref<1x16xf32, #tpu.memory_space<vmem>>, %arg7: memref<16x8xf32, #tpu.memory_space<vmem>>, %arg8: memref<1x8xf32, #tpu.memory_space<vmem>>, %arg9: memref<8x8xf32, #tpu.memory_space<vmem>>, %arg10: memref<8x32xf32, #tpu.memory_space<vmem>>, %arg11: memref<8x32xf32, #tpu.memory_space<vmem>>) attributes {dimension_semantics = [#tpu.dimension_semantics<parallel>, #tpu.dimension_semantics<arbitrary>], iteration_bounds = array<i64: 1, 4>, scalar_prefetch = 0 : i64, scratch_operands = 2 : i64, tpu.core_type = #tpu.core_type<tc>, window_params = [{transform_indices = @transform_0, window_bounds = array<i64: 2, 8, 128>}, {transform_indices = @transform_1, window_bounds = array<i64: 8, 128>}, {pipeline_mode = #tpu.pipeline_mode<synchronous>, transform_indices = @transform_2, window_bounds = array<i64: 32, 128>}, {pipeline_mode = #tpu.pipeline_mode<synchronous>, transform_indices = @transform_3, window_bounds = array<i64: 2, 32, 16>}, {pipeline_mode = #tpu.pipeline_mode<synchronous>, transform_indices = @transform_4, window_bounds = array<i64: 1, 16>}, {pipeline_mode = #tpu.pipeline_mode<synchronous>, transform_indices = @transform_5, window_bounds = array<i64: 16, 8>}, {pipeline_mode = #tpu.pipeline_mode<synchronous>, transform_indices = @transform_6, window_bounds = array<i64: 1, 8>}, {transform_indices = @transform_7, window_bounds = array<i64: 8, 8>}]} {
    %c0_i32 = arith.constant 0 : i32
    %0 = arith.cmpi eq, %arg1, %c0_i32 : i32
    %1 = arith.extui %0 : i1 to i32
    %c0_i32_0 = arith.constant 0 : i32
    %2 = arith.cmpi ne, %1, %c0_i32_0 : i32
    scf.if %2 {
      %cst_23 = arith.constant 0.000000e+00 : f32
      %55 = vector.broadcast %cst_23 : f32 to vector<8x32xf32>
      %c0_24 = arith.constant 0 : index
      %c0_25 = arith.constant 0 : index
      %56 = vector.load %arg10[%c0_24, %c0_25] : memref<8x32xf32, #tpu.memory_space<vmem>>, vector<8x32xf32>
      tpu.vector_store %arg10[%c0_24, %c0_25], %55 {strides = array<i32>} : memref<8x32xf32, #tpu.memory_space<vmem>>, vector<8x32xf32>,
      %cst_26 = arith.constant 0.000000e+00 : f32
      %57 = vector.broadcast %cst_26 : f32 to vector<8x32xf32>
      %c0_27 = arith.constant 0 : index
      %c0_28 = arith.constant 0 : index
      %58 = vector.load %arg11[%c0_27, %c0_28] : memref<8x32xf32, #tpu.memory_space<vmem>>, vector<8x32xf32>
      tpu.vector_store %arg11[%c0_27, %c0_28], %57 {strides = array<i32>} : memref<8x32xf32, #tpu.memory_space<vmem>>, vector<8x32xf32>,
    } else {
    }
    %c0 = arith.constant 0 : index
    %c0_1 = arith.constant 0 : index
    %3 = vector.load %arg4[%c0, %c0_1] : memref<32x128xf32, #tpu.memory_space<vmem>>, vector<32x128xf32>
    %c0_2 = arith.constant 0 : index
    %c0_3 = arith.constant 0 : index
    %4 = vector.load %arg10[%c0_2, %c0_3] : memref<8x32xf32, #tpu.memory_space<vmem>>, vector<8x32xf32>
    %c0_4 = arith.constant 0 : index
    %c0_5 = arith.constant 0 : index
    %5 = vector.load %arg11[%c0_4, %c0_5] : memref<8x32xf32, #tpu.memory_space<vmem>>, vector<8x32xf32>
    %c0_6 = arith.constant 0 : index
    %c0_7 = arith.constant 0 : index
    %c0_8 = arith.constant 0 : index
    %6 = vector.load %arg2[%c0_6, %c0_7, %c0_8] : memref<2x8x128xf32, #tpu.memory_space<vmem>>, vector<1x8x128xf32>
    %7 = vector.shape_cast %6 : vector<1x8x128xf32> to vector<8x128xf32>
    %cst = arith.constant dense<0.000000e+00> : vector<8x128xf32>
    %8 = tpu.matmul %4, %3, %cst {dimension_numbers = #tpu.dot_dimension_numbers<[1], [0], [0], [1], [0, 0, 1, 1], [], []>} : vector<8x32xf32>, vector<32x128xf32>, vector<8x128xf32> -> vector<8x128xf32>
    %9 = arith.addf %7, %8 : vector<8x128xf32>
    %10 = arith.negf %9 : vector<8x128xf32>
    %11 = math.exp %10 : vector<8x128xf32>
    %cst_9 = arith.constant 1.000000e+00 : f32
    %12 = vector.broadcast %cst_9 : f32 to vector<8x128xf32>
    %13 = arith.addf %12, %11 : vector<8x128xf32>
    %14 = arith.divf %12, %13 : vector<8x128xf32>
    %15 = vector.extract_strided_slice %14 {offsets = [0, 0], sizes = [8, 32], strides = [1, 1]} : vector<8x128xf32> to vector<8x32xf32>
    %16 = vector.extract_strided_slice %14 {offsets = [0, 32], sizes = [8, 32], strides = [1, 1]} : vector<8x128xf32> to vector<8x32xf32>
    %17 = vector.extract_strided_slice %14 {offsets = [0, 64], sizes = [8, 32], strides = [1, 1]} : vector<8x128xf32> to vector<8x32xf32>
    %cst_10 = arith.constant 2.000000e+00 : f32
    %18 = vector.broadcast %cst_10 : f32 to vector<8x32xf32>
    %19 = arith.mulf %18, %17 : vector<8x32xf32>
    %cst_11 = arith.constant 1.000000e+00 : f32
    %20 = vector.broadcast %cst_11 : f32 to vector<8x32xf32>
    %21 = arith.subf %19, %20 : vector<8x32xf32>
    %22 = vector.extract_strided_slice %14 {offsets = [0, 96], sizes = [8, 32], strides = [1, 1]} : vector<8x128xf32> to vector<8x32xf32>
    %23 = arith.mulf %16, %5 : vector<8x32xf32>
    %24 = arith.mulf %15, %21 : vector<8x32xf32>
    %25 = arith.addf %23, %24 : vector<8x32xf32>
    %26 = math.tanh %25 : vector<8x32xf32>
    %27 = arith.mulf %22, %26 : vector<8x32xf32>
    %c1 = arith.constant 1 : index
    %c0_12 = arith.constant 0 : index
    %c0_13 = arith.constant 0 : index
    %28 = vector.load %arg2[%c1, %c0_12, %c0_13] : memref<2x8x128xf32, #tpu.memory_space<vmem>>, vector<1x8x128xf32>
    %29 = vector.shape_cast %28 : vector<1x8x128xf32> to vector<8x128xf32>
    %cst_14 = arith.constant dense<0.000000e+00> : vector<8x128xf32>
    %30 = tpu.matmul %27, %3, %cst_14 {dimension_numbers = #tpu.dot_dimension_numbers<[1], [0], [0], [1], [0, 0, 1, 1], [], []>} : vector<8x32xf32>, vector<32x128xf32>, vector<8x128xf32> -> vector<8x128xf32>
    %31 = arith.addf %29, %30 : vector<8x128xf32>
    %32 = arith.negf %31 : vector<8x128xf32>
    %33 = math.exp %32 : vector<8x128xf32>
    %cst_15 = arith.constant 1.000000e+00 : f32
    %34 = vector.broadcast %cst_15 : f32 to vector<8x128xf32>
    %35 = arith.addf %34, %33 : vector<8x128xf32>
    %36 = arith.divf %34, %35 : vector<8x128xf32>
    %37 = vector.extract_strided_slice %36 {offsets = [0, 0], sizes = [8, 32], strides = [1, 1]} : vector<8x128xf32> to vector<8x32xf32>
    %38 = vector.extract_strided_slice %36 {offsets = [0, 32], sizes = [8, 32], strides = [1, 1]} : vector<8x128xf32> to vector<8x32xf32>
    %39 = vector.extract_strided_slice %36 {offsets = [0, 64], sizes = [8, 32], strides = [1, 1]} : vector<8x128xf32> to vector<8x32xf32>
    %cst_16 = arith.constant 2.000000e+00 : f32
    %40 = vector.broadcast %cst_16 : f32 to vector<8x32xf32>
    %41 = arith.mulf %40, %39 : vector<8x32xf32>
    %cst_17 = arith.constant 1.000000e+00 : f32
    %42 = vector.broadcast %cst_17 : f32 to vector<8x32xf32>
    %43 = arith.subf %41, %42 : vector<8x32xf32>
    %44 = vector.extract_strided_slice %36 {offsets = [0, 96], sizes = [8, 32], strides = [1, 1]} : vector<8x128xf32> to vector<8x32xf32>
    %45 = arith.mulf %38, %25 : vector<8x32xf32>
    %46 = arith.mulf %37, %43 : vector<8x32xf32>
    %47 = arith.addf %45, %46 : vector<8x32xf32>
    %48 = math.tanh %47 : vector<8x32xf32>
    %49 = arith.mulf %44, %48 : vector<8x32xf32>
    %c0_18 = arith.constant 0 : index
    %c0_19 = arith.constant 0 : index
    %50 = vector.load %arg10[%c0_18, %c0_19] : memref<8x32xf32, #tpu.memory_space<vmem>>, vector<8x32xf32>
    tpu.vector_store %arg10[%c0_18, %c0_19], %49 {strides = array<i32>} : memref<8x32xf32, #tpu.memory_space<vmem>>, vector<8x32xf32>,
    %c0_20 = arith.constant 0 : index
    %c0_21 = arith.constant 0 : index
    %51 = vector.load %arg11[%c0_20, %c0_21] : memref<8x32xf32, #tpu.memory_space<vmem>>, vector<8x32xf32>
    tpu.vector_store %arg11[%c0_20, %c0_21], %47 {strides = array<i32>} : memref<8x32xf32, #tpu.memory_space<vmem>>, vector<8x32xf32>,
    %c3_i32 = arith.constant 3 : i32
    %52 = arith.cmpi eq, %arg1, %c3_i32 : i32
    %53 = arith.extui %52 : i1 to i32
    %c0_i32_22 = arith.constant 0 : i32
    %54 = arith.cmpi ne, %53, %c0_i32_22 : i32
    scf.if %54 {
      %c0_23 = arith.constant 0 : index
      %c0_24 = arith.constant 0 : index
      %55 = vector.load %arg3[%c0_23, %c0_24] : memref<8x128xf32, #tpu.memory_space<vmem>>, vector<8x128xf32>
      %56 = arith.negf %55 : vector<8x128xf32>
      %57 = math.exp %56 : vector<8x128xf32>
      %cst_25 = arith.constant 1.000000e+00 : f32
      %58 = vector.broadcast %cst_25 : f32 to vector<8x128xf32>
      %59 = arith.addf %58, %57 : vector<8x128xf32>
      %60 = arith.divf %58, %59 : vector<8x128xf32>
      %61 = vector.extract_strided_slice %60 {offsets = [0, 0], sizes = [8, 32], strides = [1, 1]} : vector<8x128xf32> to vector<8x32xf32>
      %62 = vector.extract_strided_slice %60 {offsets = [0, 64], sizes = [8, 32], strides = [1, 1]} : vector<8x128xf32> to vector<8x32xf32>
      %cst_26 = arith.constant 2.000000e+00 : f32
      %63 = vector.broadcast %cst_26 : f32 to vector<8x32xf32>
      %64 = arith.mulf %63, %62 : vector<8x32xf32>
      %cst_27 = arith.constant 1.000000e+00 : f32
      %65 = vector.broadcast %cst_27 : f32 to vector<8x32xf32>
      %66 = arith.subf %64, %65 : vector<8x32xf32>
      %67 = vector.extract_strided_slice %60 {offsets = [0, 96], sizes = [8, 32], strides = [1, 1]} : vector<8x128xf32> to vector<8x32xf32>
      %68 = arith.mulf %61, %66 : vector<8x32xf32>
      %69 = math.tanh %68 : vector<8x32xf32>
      %70 = arith.mulf %67, %69 : vector<8x32xf32>
      %c0_28 = arith.constant 0 : index
      %c0_29 = arith.constant 0 : index
      %c0_30 = arith.constant 0 : index
      %71 = vector.load %arg5[%c0_28, %c0_29, %c0_30] : memref<2x32x16xf32, #tpu.memory_space<vmem>>, vector<1x32x16xf32>
      %72 = vector.shape_cast %71 : vector<1x32x16xf32> to vector<32x16xf32>
      %cst_31 = arith.constant dense<0.000000e+00> : vector<8x16xf32>
      %73 = tpu.matmul %49, %72, %cst_31 {dimension_numbers = #tpu.dot_dimension_numbers<[1], [0], [0], [1], [0, 0, 1, 1], [], []>} : vector<8x32xf32>, vector<32x16xf32>, vector<8x16xf32> -> vector<8x16xf32>
      %c1_32 = arith.constant 1 : index
      %c0_33 = arith.constant 0 : index
      %c0_34 = arith.constant 0 : index
      %74 = vector.load %arg5[%c1_32, %c0_33, %c0_34] : memref<2x32x16xf32, #tpu.memory_space<vmem>>, vector<1x32x16xf32>
      %75 = vector.shape_cast %74 : vector<1x32x16xf32> to vector<32x16xf32>
      %cst_35 = arith.constant dense<0.000000e+00> : vector<8x16xf32>
      %76 = tpu.matmul %70, %75, %cst_35 {dimension_numbers = #tpu.dot_dimension_numbers<[1], [0], [0], [1], [0, 0, 1, 1], [], []>} : vector<8x32xf32>, vector<32x16xf32>, vector<8x16xf32> -> vector<8x16xf32>
      %77 = arith.addf %73, %76 : vector<8x16xf32>
      %c0_36 = arith.constant 0 : index
      %c0_37 = arith.constant 0 : index
      %78 = vector.load %arg6[%c0_36, %c0_37] : memref<1x16xf32, #tpu.memory_space<vmem>>, vector<1x16xf32>
      %79 = vector.broadcast %78 : vector<1x16xf32> to vector<8x16xf32>
      %80 = arith.addf %77, %79 : vector<8x16xf32>
      %c0_38 = arith.constant 0 : index
      %c0_39 = arith.constant 0 : index
      %81 = vector.load %arg7[%c0_38, %c0_39] : memref<16x8xf32, #tpu.memory_space<vmem>>, vector<16x8xf32>
      %cst_40 = arith.constant dense<0.000000e+00> : vector<8x8xf32>
      %82 = tpu.matmul %80, %81, %cst_40 {dimension_numbers = #tpu.dot_dimension_numbers<[1], [0], [0], [1], [0, 0, 1, 1], [], []>} : vector<8x16xf32>, vector<16x8xf32>, vector<8x8xf32> -> vector<8x8xf32>
      %c0_41 = arith.constant 0 : index
      %c0_42 = arith.constant 0 : index
      %83 = vector.load %arg8[%c0_41, %c0_42] : memref<1x8xf32, #tpu.memory_space<vmem>>, vector<1x8xf32>
      %84 = vector.broadcast %83 : vector<1x8xf32> to vector<8x8xf32>
      %85 = arith.addf %82, %84 : vector<8x8xf32>
      %c0_43 = arith.constant 0 : index
      %c0_44 = arith.constant 0 : index
      %86 = vector.load %arg9[%c0_43, %c0_44] : memref<8x8xf32, #tpu.memory_space<vmem>>, vector<8x8xf32>
      tpu.vector_store %arg9[%c0_43, %c0_44], %85 {strides = array<i32>} : memref<8x8xf32, #tpu.memory_space<vmem>>, vector<8x8xf32>,
    } else {
    }
    return
  }
  func.func @transform_0(%arg0: i32, %arg1: i32) -> (i32, i32, i32) {
    %c0_i32 = arith.constant 0 : i32
    %c0_i32_0 = arith.constant 0 : i32
    return %arg1, %arg0, %c0_i32 : i32, i32, i32
  }
  func.func @transform_1(%arg0: i32, %arg1: i32) -> (i32, i32) {
    %c0_i32 = arith.constant 0 : i32
    %c0_i32_0 = arith.constant 0 : i32
    return %arg0, %c0_i32 : i32, i32
  }
  func.func @transform_2(%arg0: i32, %arg1: i32) -> (i32, i32) {
    %c0_i32 = arith.constant 0 : i32
    %c0_i32_0 = arith.constant 0 : i32
    %c0_i32_1 = arith.constant 0 : i32
    return %c0_i32, %c0_i32_0 : i32, i32
  }
  func.func @transform_3(%arg0: i32, %arg1: i32) -> (i32, i32, i32) {
    %c0_i32 = arith.constant 0 : i32
    %c0_i32_0 = arith.constant 0 : i32
    %c0_i32_1 = arith.constant 0 : i32
    %c0_i32_2 = arith.constant 0 : i32
    return %c0_i32, %c0_i32_0, %c0_i32_1 : i32, i32, i32
  }
  func.func @transform_4(%arg0: i32, %arg1: i32) -> (i32, i32) {
    %c0_i32 = arith.constant 0 : i32
    %c0_i32_0 = arith.constant 0 : i32
    %c0_i32_1 = arith.constant 0 : i32
    return %c0_i32, %c0_i32_0 : i32, i32
  }
  func.func @transform_5(%arg0: i32, %arg1: i32) -> (i32, i32) {
    %c0_i32 = arith.constant 0 : i32
    %c0_i32_0 = arith.constant 0 : i32
    %c0_i32_1 = arith.constant 0 : i32
    return %c0_i32, %c0_i32_0 : i32, i32
  }
  func.func @transform_6(%arg0: i32, %arg1: i32) -> (i32, i32) {
    %c0_i32 = arith.constant 0 : i32
    %c0_i32_0 = arith.constant 0 : i32
    %c0_i32_1 = arith.constant 0 : i32
    return %c0_i32, %c0_i32_0 : i32, i32
  }
  func.func @transform_7(%arg0: i32, %arg1: i32) -> (i32, i32) {
    %c0_i32 = arith.constant 0 : i32
    %c0_i32_0 = arith.constant 0 : i32
    return %arg0, %c0_i32 : i32, i32
  }
}

</mosaic_0001>

<bundles_post_ra>
// kernel: mul.15
= control target key start
LH: loop header
LB: loop body
LE: loop exit
PB: predicated region body
PF: predicated region fallthrough
CT: control target
= control target key end

     0   :  { %s37_s8 = smov 32   ;;  %s38_s9 = smov 64   ;;  %vm7_vm0 = vcmask 261120   ;;  %vm13_vm1 = vcmask 1048320   ;;  %vm19_vm2 = vcmask 785920   ;;  %vm25_vm3 = vcmask 523520   ;;  %s55_s0 = inlined_call_operand.vmem [shape: f32[4,32], index: 0, kind: input, shape index: {}]   ;;  %s56_s1 = inlined_call_operand.vmem [shape: f32[128], index: 1, kind: output, shape index: {}]  }
   0x1   :  { %v4_v0 = vld [vmem:[%s55_s0] sm:$0xf]  ;;  %s36_s0 = smov 96  }
   0x2   :  { %5 = vst [vmem:[#allocation1] sm:$0xf] %v4_v0 }
   0x9   :  { %v10_v1 = vld [vmem:[#allocation1 + $0x3] sm:$0x1]   ;;  %v22_v2 = vld [vmem:[#allocation1 + $0x1] sm:$0x1]   ;;  %v16_v3 = vld [vmem:[#allocation1 + $0x2] sm:$0x1]  }
   0xa   :  { %11 = vrot.lane.b32.xlu0 %v10_v1, %s36_s0  ;;  %23 = vrot.lane.b32.xlu1 %v22_v2, %s37_s8  ;;  %v6_v4 = vld [vmem:[#allocation1] sm:$0x1]  }
   0xb   :  { %8 = vst.msk [vmem:[#allocation0] sm:$0x1] %vm7_vm0, %v6_v4  }
  0x12   :  { %17 = vrot.lane.b32.xlu0 %v16_v3, %s38_s9 }
  0x7c   :  { %v12_v5 = vpop.permute.xlu0 %11   ;;  %v24_v6 = vpop.permute.xlu1 %23  }
  0x7d   :  { %14 = vst.msk [vmem:[#allocation0] sm:$0x1] %vm13_vm1, %v12_v5  }
  0x84   :  { %v18_v7 = vpop.permute.xlu0 %17  }
  0x85   :  { %20 = vst.msk [vmem:[#allocation0] sm:$0x1] %vm19_vm2, %v18_v7  }
  0x86   :  { %26 = vst.msk [vmem:[#allocation0] sm:$0x1] %vm25_vm3, %v24_v6  }
  0x8d   :  { %v29_v8 = vld [vmem:[#allocation0] sm:$0x1] }
  0x8e   :  { %32 = vst [vmem:[%s56_s1] sm:$0x1] %v29_v8 }

// kernel: _lstm_forward_impl.1
= control target key start
LH: loop header
LB: loop body
LE: loop exit
PB: predicated region body
PF: predicated region fallthrough
CT: control target
= control target key end

     0   :  { %s833_s24 = smov 0   ;;  %s835_s25 = smov 0   ;;  %s941_s0 = inlined_call_operand.vmem [shape: f32[8,8,128], index: 0, kind: input, shape index: {}]   ;;  %s942_s1 = inlined_call_operand.vmem [shape: f32[8,128], index: 1, kind: input, shape index: {}]   ;;  %s943_s2 = inlined_call_operand.vmem [shape: f32[32,128], index: 2, kind: input, shape index: {}]   ;;  %s944_s3 = inlined_call_operand.vmem [shape: f32[2,32,16], index: 3, kind: input, shape index: {}]   ;;  %s945_s4 = inlined_call_operand.vmem [shape: f32[1,16], index: 4, kind: input, shape index: {}]   ;;  %s946_s5 = inlined_call_operand.vmem [shape: f32[16,8], index: 5, kind: input, shape index: {}]   ;;  %s947_s6 = inlined_call_operand.vmem [shape: f32[1,8], index: 6, kind: input, shape index: {}]   ;;  %s948_s7 = inlined_call_operand.vmem [shape: f32[8,8], index: 7, kind: output, shape index: {}]  }
   0x1   :  { %s837_s26 = smov 0  }
   0x2 LB: > { %s26_s27 = sadd.s32 1, %s780_s25  ;;  %p687_p0 = scmp.ge.s32.totalorder %s784_s26, 1  ;;  %s784_s26 = sphi %s837_s26, %s17_s26   ;;  %s780_s25 = sphi %s835_s25, %s950_s25   ;;  %s776_s24 = sphi %s833_s24, %s949_s24  }
   0x3   : > { %p27_p1 = scmp.ge.s32.totalorder %s26_s27, 4  ;;  %p264_p2 = scmp.lt.s32.totalorder %s784_s26, 5 }
   0x5   : > { %s952_s27 = smov (%p27_p1, %s26_s27), 0  ;;  %p265_p3 = pnand %p687_p0, %p264_p2 }
   0x6   : > { %s688_s28 = sshll.u32 (!%p265_p3), %s776_s24, 1  ;;  %p690_p5 = scmp.ne.s32.totalorder (!%p265_p3), %s776_s24, 0 }
   0x7   : > { %268 = sbr.rel (%p265_p3) target bundleno = 1877 (0x755), region = 48  ;;  %p303_p4 = scmp.lt.s32.totalorder (!%p265_p3), %s688_s28, 7 }
   0xc   : > { %s954_s28 = smov (!%p303_p4, %s688_s28), 7  ;;  %322 = sbr.rel (%p690_p5) target bundleno = 20 (0x14), region = 52 }
   0xd   : > { %s689_s29 = sshll.u32 %s954_s28, 3 }
   0xe   : > { %s857_s9 = scalar_lea.vmem %s941_s0, %s689_s29 }
  0x11   : > { %vm323_vm0 = vcmask 261120   ;;  %v786_v0 = vmov 0.0  }
  0x12   : > { %324 = vst.msk [vmem:[#allocation2] sm:$0xff] %vm323_vm0, %v786_v0 }
  0x13   : > { %325 = vst.msk [vmem:[#allocation3] sm:$0xff] %vm323_vm0, %v786_v0 }
  0x14 PF: > { %v329_v1 = vld [vmem:[%s943_s2 + $0x18] sm:$0xff]  ;;  %v328_v2 = vld [vmem:[%s943_s2 + $0x10] sm:$0xff]  ;;  %v327_v3 = vld [vmem:[%s943_s2 + $0x8] sm:$0xff]  ;;  %vm333_vm1 = vcmask 261120   ;;  %s787_s18 = smov 64   ;;  %s788_s19 = smov 32  }
  0x15   : > { %349 = vmatpush.msra.mxu0 %v329_v1  ;;  %419 = vmatpush.msra.mxu1 %v329_v1  ;;  %v326_v4 = vld [vmem:[%s943_s2] sm:$0xff]  ;;  %v694_v35 = vld [vmem:[%s857_s9 + $0x8] sm:$0xff]  ;;  %s789_s20 = smov 96   ;;  %p698_p6 = scmp.ne.s32.totalorder %s776_s24, 3 }
  0x16   : > { %v332_v6 = vld [vmem:[%s857_s9] sm:$0xff]  ;;  %s790_s23 = smov (!%p698_p6), 64   ;;  %s791_s24 = smov (!%p698_p6), 96  }
  0x17   : > { %350 = vmatpush.msra.mxu0 %v328_v2  ;;  %420 = vmatpush.msra.mxu1 %v328_v2  ;;  %s792_s21 = smov (!%p698_p6), 32  }
  0x19   : > { %351 = vmatpush.msra.mxu0 %v327_v3  ;;  %v330_v5 = vld [vmem:[#allocation2] sm:$0xff]  ;;  %421 = vmatpush.msra.mxu1 %v327_v3 }
  0x1a   : > { %v331_v24 = vld [vmem:[#allocation3] sm:$0xff] }
  0x1b   : > { %352 = vmatpush.msra.mxu0 %v326_v4  ;;  %422 = vmatpush.msra.mxu1 %v326_v4 }
  0x1c   : > { %691 = vmatmul.msk.f32.vlgmr.msra.gmra.mxu0 %vm333_vm1, %v330_v5 }
  0x99   : > { %v354_v7 = vpop.f32.mrf.mxu0 }
  0x9a   : > { %v357_v8 = vadd.f32 %v354_v7, %v332_v6 }
  0x9c   : > { %v692_v9 = vmul.f32 -1.442695, %v357_v8 }
  0x9e   : > { %742 = vpow2.f32 %v692_v9 }
  0xa4   : > { %v743_v10 = vpop.eup %742 }
  0xa5   : > { %v361_v11 = vadd.f32 1.0, %v743_v10 }
  0xa7   : > { %744 = vrcp.f32 %v361_v11  ;;  %v373_v15 = vand.u32 2147483648, %v361_v11  ;;  %v371_v17 = vand.u32 2147483647, %v361_v11  ;;  %vm367_vm3 = vweird.f32 %v361_v11 }
  0xa9   : > { %v374_v19 = vor.u32 1.1754944e-38, %v373_v15  ;;  %vm372_vm5 = vcmp.eq.f32.partialorder %v371_v17, 8.507059e+37 }
  0xad   : > { %v745_v12 = vpop.eup %744 }
  0xae   : > { %v363_v13 = vmul.f32 %v745_v12, %v361_v11  ;;  %vm368_vm2 = vweird.f32 %v745_v12 }
  0xaf   : > { %vm369_vm4 = vmor %vm367_vm3, %vm368_vm2 }
  0xb0   : > { %v364_v14 = vsub.f32 1.0, %v363_v13 }
  0xb2   : > { %v365_v16 = vmul.f32 %v745_v12, %v364_v14 }
  0xb4   : > { %v366_v18 = vadd.f32 %v745_v12, %v365_v16 }
  0xb6   : > { %v370_v20 = vsel %vm369_vm4, %v745_v12, %v366_v18 }
  0xb7   : > { %v375_v21 = vsel %vm372_vm5, %v374_v19, %v370_v20 }
  0xb8   : > { %v377_v22 = vmul.f32 2.0, %v375_v21 }
  0xba   : > { %v693_v23 = vadd.f32 -1.0, %v377_v22 }
  0xbc   : > { %385 = vrot.lane.b32.xlu0 %v693_v23, %s787_s18 }
  0xc4   : > { %380 = vrot.lane.b32.xlu0 %v331_v24, %s788_s19 }
 0x12e   : > { %v386_v25 = vpop.permute.xlu0 %385 }
 0x12f   : > { %v388_v26 = vmul.f32 %v386_v25, %v375_v21 }
 0x131   : > { %390 = vrot.lane.b32.xlu1 %v388_v26, %s788_s19 }
 0x136   : > { %v381_v27 = vpop.permute.xlu0 %380 }
 0x137   : > { %v383_v28 = vmul.f32 %v381_v27, %v375_v21 }
 0x1a3   : > { %v391_v29 = vpop.permute.xlu1 %390 }
 0x1a4   : > { %v393_v30 = vadd.f32 %v391_v29, %v383_v28 }
 0x1a6   : > { %746 = vtanh.f32 %v393_v30 }
 0x1ac   : > { %v747_v31 = vpop.eup %746 }
 0x1ad   : > { %396 = vrot.lane.b32.xlu1 %v747_v31, %s787_s18 }
 0x21f   : > { %v397_v32 = vpop.permute.xlu1 %396 }
 0x220   : > { %v399_v33 = vmul.f32 %v397_v32, %v375_v21 }
 0x222   : > { %403 = vrot.lane.b32.xlu2 %v399_v33, %s788_s19 }
 0x27c   : > { %v404_v34 = vpop.permute.xlu2 %403 }
 0x27d   : > { %695 = vmatmul.msk.f32.vlgmr.msra.gmra.mxu1 %vm333_vm1, %v404_v34 }
 0x2fa   : > { %v424_v36 = vpop.f32.mrf.mxu1 }
 0x2fb   : > { %v427_v37 = vadd.f32 %v694_v35, %v424_v36 }
 0x2fd   : > { %v696_v38 = vmul.f32 -1.442695, %v427_v37 }
 0x2ff   : > { %748 = vpow2.f32 %v696_v38 }
 0x305   : > { %v749_v39 = vpop.eup %748 }
 0x306   : > { %v431_v40 = vadd.f32 1.0, %v749_v39 }
 0x308   : > { %750 = vrcp.f32 %v431_v40  ;;  %v443_v44 = vand.u32 2147483648, %v431_v40  ;;  %v441_v46 = vand.u32 2147483647, %v431_v40  ;;  %vm437_vm7 = vweird.f32 %v431_v40 }
 0x30a   : > { %v444_v48 = vor.u32 1.1754944e-38, %v443_v44  ;;  %vm442_vm9 = vcmp.eq.f32.partialorder %v441_v46, 8.507059e+37 }
 0x30e   : > { %v751_v41 = vpop.eup %750 }
 0x30f   : > { %v433_v42 = vmul.f32 %v751_v41, %v431_v40  ;;  %vm438_vm6 = vweird.f32 %v751_v41 }
 0x310   : > { %vm439_vm8 = vmor %vm437_vm7, %vm438_vm6 }
 0x311   : > { %v434_v43 = vsub.f32 1.0, %v433_v42 }
 0x313   : > { %v435_v45 = vmul.f32 %v751_v41, %v434_v43 }
 0x315   : > { %v436_v47 = vadd.f32 %v751_v41, %v435_v45 }
 0x317   : > { %v440_v49 = vsel %vm439_vm8, %v751_v41, %v436_v47 }
 0x318   : > { %v445_v50 = vsel %vm442_vm9, %v444_v48, %v440_v49 }
 0x319   : > { %v447_v51 = vmul.f32 2.0, %v445_v50  ;;  %v449_v55 = vmul.f32 %v445_v50, %v393_v30 }
 0x31b   : > { %v697_v52 = vadd.f32 -1.0, %v447_v51 }
 0x31d   : > { %451 = vrot.lane.b32.xlu2 %v697_v52, %s787_s18 }
 0x377   : > { %v452_v53 = vpop.permute.xlu2 %451 }
 0x378   : > { %v454_v54 = vmul.f32 %v452_v53, %v445_v50 }
 0x37a   : > { %456 = vrot.lane.b32.xlu0 %v454_v54, %s788_s19 }
 0x3ec   : > { %v457_v56 = vpop.permute.xlu0 %456 }
 0x3ed   : > { %v459_v57 = vadd.f32 %v457_v56, %v449_v55 }
 0x3ef   : > { %752 = vtanh.f32 %v459_v57  ;;  %472 = vrot.lane.b32.xlu0 %v459_v57, %s789_s20 }
 0x3f5   : > { %v753_v58 = vpop.eup %752 }
 0x3f6   : > { %462 = vrot.lane.b32.xlu1 %v753_v58, %s787_s18 }
 0x461   : > { %v473_v59 = vpop.permute.xlu0 %472 }
 0x462   : > { %475 = vst.msk [vmem:[#allocation3] sm:$0xff] %vm333_vm1, %v473_v59 }
 0x468   : > { %v463_v60 = vpop.permute.xlu1 %462 }
 0x469   : > { %v465_v61 = vmul.f32 %v463_v60, %v445_v50 }
 0x46b   : > { %467 = vrot.lane.b32.xlu2 %v465_v61, %s788_s19 }
 0x4c2   : > { %479 = sbr.rel (%p698_p6) target bundleno = 1877 (0x755), region = 56 }
 0x4c5   : > { %v468_v62 = vpop.permute.xlu2 %467 }
 0x4c6   : > { %470 = vst.msk [vmem:[#allocation2] sm:$0xff] %vm333_vm1, %v468_v62 }
 0x4c7   : > { %v480_v63 = vld [vmem:[%s942_s1] sm:$0xff]  ;;  %v704_v18 = vld [vmem:[%s944_s3 + $0x38] sm:$0xff]  ;;  %v703_v20 = vld [vmem:[%s944_s3 + $0x30] sm:$0xff]  ;;  %vm580_vm14 = vcmask 130048   ;;  %vm604_vm15 = vcmask 64512  }
 0x4c8   : > { %v699_v0 = vmul.f32 -1.442695, %v480_v63  ;;  %v516_v19 = vld [vmem:[%s944_s3 + $0x18] sm:$0xff]  ;;  %539 = vmatpush.msra.mxu0 %v704_v18  ;;  %v515_v21 = vld [vmem:[%s944_s3 + $0x10] sm:$0xff]  ;;  %v702_v22 = vld [vmem:[%s944_s3 + $0x28] sm:$0xff] }
 0x4c9   : > { %561 = vmatpush.msra.mxu1 %v516_v19  ;;  %v514_v23 = vld [vmem:[%s944_s3 + $0x8] sm:$0xff]  ;;  %v701_v24 = vld [vmem:[%s944_s3 + $0x20] sm:$0xff] }
 0x4ca   : > { %756 = vpow2.f32 %v699_v0  ;;  %540 = vmatpush.msra.mxu0 %v703_v20  ;;  %v513_v25 = vld [vmem:[%s944_s3] sm:$0xff]  ;;  %v575_v29 = vld [vmem:[%s946_s5 + $0x8] sm:$0xff] }
 0x4cb   : > { %562 = vmatpush.msra.mxu1 %v515_v21  ;;  %598 = vmatpush.msra.mxu2 %v575_v29  ;;  %v574_v30 = vld [vmem:[%s946_s5] sm:$0xff] }
 0x4cc   : > { %541 = vmatpush.msra.mxu0 %v702_v22  ;;  %v754_v32 = vld [vmem:[%s945_s4] ss:$0 sm:$0xff] }
 0x4cd   : > { %563 = vmatpush.msra.mxu1 %v514_v23  ;;  %599 = vmatpush.msra.mxu2 %v574_v30  ;;  %v755_v36 = vld [vmem:[%s947_s6] ss:$0 sm:$0xff] }
 0x4ce   : > { %542 = vmatpush.msra.mxu0 %v701_v24 }
 0x4cf   : > { %564 = vmatpush.msra.mxu1 %v513_v25 }
 0x4d0   : > { %v757_v1 = vpop.eup %756  ;;  %706 = vmatmul.msk.f32.vlgmr.msra.gmra.mxu1 %vm333_vm1, %v468_v62 }
 0x4d1   : > { %v484_v2 = vadd.f32 1.0, %v757_v1 }
 0x4d3   : > { %758 = vrcp.f32 %v484_v2  ;;  %v496_v5 = vand.u32 2147483648, %v484_v2  ;;  %vm490_vm10 = vweird.f32 %v484_v2  ;;  %v494_v7 = vand.u32 2147483647, %v484_v2 }
 0x4d5   : > { %v497_v9 = vor.u32 1.1754944e-38, %v496_v5  ;;  %vm495_vm13 = vcmp.eq.f32.partialorder %v494_v7, 8.507059e+37 }
 0x4d9   : > { %v759_v3 = vpop.eup %758 }
 0x4da   : > { %v486_v4 = vmul.f32 %v759_v3, %v484_v2  ;;  %vm491_vm11 = vweird.f32 %v759_v3 }
 0x4db   : > { %vm492_vm12 = vmor %vm490_vm10, %vm491_vm11 }
 0x4dc   : > { %v487_v6 = vsub.f32 1.0, %v486_v4 }
 0x4de   : > { %v488_v8 = vmul.f32 %v759_v3, %v487_v6 }
 0x4e0   : > { %v489_v10 = vadd.f32 %v759_v3, %v488_v8 }
 0x4e2   : > { %v493_v11 = vsel %vm492_vm12, %v759_v3, %v489_v10 }
 0x4e3   : > { %v498_v12 = vsel %vm495_vm13, %v497_v9, %v493_v11 }
 0x4e4   : > { %v500_v13 = vmul.f32 2.0, %v498_v12 }
 0x4e6   : > { %v700_v14 = vadd.f32 -1.0, %v500_v13 }
 0x4e8   : > { %503 = vrot.lane.b32.xlu0 %v700_v14, %s790_s23 }
 0x54d   : > { %v566_v31 = vpop.f32.mrf.mxu1 }
 0x55a   : > { %v504_v15 = vpop.permute.xlu0 %503 }
 0x55b   : > { %v506_v16 = vmul.f32 %v504_v15, %v498_v12 }
 0x55d   : > { %760 = vtanh.f32 %v506_v16 }
 0x563   : > { %v761_v17 = vpop.eup %760 }
 0x564   : > { %509 = vrot.lane.b32.xlu0 %v761_v17, %s791_s24 }
 0x5d6   : > { %v510_v26 = vpop.permute.xlu0 %509 }
 0x5d7   : > { %v512_v27 = vmul.f32 %v510_v26, %v498_v12 }
 0x5d9   : > { %523 = vrot.lane.b32.xlu1 %v512_v27, %s792_s21 }
 0x64b   : > { %v524_v28 = vpop.permute.xlu1 %523 }
 0x64c   : > { %705 = vmatmul.msk.f32.vlgmr.msra.gmra.mxu0 %vm333_vm1, %v524_v28 }
 0x6c9   : > { %v544_v33 = vpop.f32.mrf.mxu0 }
 0x6ca   : > { %v567_v34 = vadd.f32 %v566_v31, %v544_v33 }
 0x6cc   : > { %v573_v35 = vadd.f32 %v754_v32, %v567_v34 }
 0x6ce   : > { %707 = vmatmul.msk.f32.vlgmr.msra.gmra.mxu2 %vm580_vm14, %v573_v35 }
 0x751   : > { %v601_v37 = vpop.f32.mrf.mxu2 }
 0x752   : > { %v602_v38 = vadd.f32 %v755_v36, %v601_v37 }
 0x754   : > { %605 = vst.msk [vmem:[%s948_s7] sm:$0xff] %vm604_vm15, %v602_v38 }
 0x755 PF: > { %s17_s26 = sadd.s32 1, %s784_s26   ;;  %s949_s24 = smov %s780_s25 }
 0x756   : > { %p14_p7 = scmp.ge.s32.totalorder %s17_s26, 6   ;;  %s950_s25 = smov %s952_s27 }
 0x758   :  { %16 = sbr.rel (!%p14_p7) target bundleno = 2 (0x2), region = 91 }

</bundles_post_ra>
